<compile_context>
chip_gen: v7x
topology: tpu7x:2x2x1
jax: 0.10.0
libtpu: 0.0.40
codegen_flags: <defaults>
</compile_context>

<pallas_src>
import functools
import math
import numpy as np
import jax
import jax.numpy as jnp
from jax.experimental import pallas as pl
from jax.experimental.pallas import tpu as pltpu


def _bicubic_weight_matrix(in_size: int, out_size: int, scale_factor: float,
                           A: float = -0.75) -> np.ndarray:
    """Dense (out_size, in_size) bicubic interpolation matrix matching
    PyTorch's upsample_bicubic2d (align_corners=False, antialias=False,
    explicit-scale_factor path => coordinate scale = 1/scale_factor)."""
    scale = 1.0 / float(scale_factor)
    i = np.arange(out_size, dtype=np.float64)
    real = scale * (i + 0.5) - 0.5
    idx = np.floor(real)
    t = real - idx

    def cc1(x):  # |x| <= 1
        return ((A + 2.0) * x - (A + 3.0)) * x * x + 1.0

    def cc2(x):  # 1 < |x| < 2
        return ((A * x - 5.0 * A) * x + 8.0 * A) * x - 4.0 * A

    w = np.stack([cc2(t + 1.0), cc1(t), cc1(1.0 - t), cc2(2.0 - t)], axis=1)  # (out, 4)
    cols = idx[:, None].astype(np.int64) - 1 + np.arange(4)[None, :]          # (out, 4)
    cols = np.clip(cols, 0, in_size - 1)                                      # border replicate
    rows = np.repeat(np.arange(out_size, dtype=np.int64), 4)

    W = np.zeros((out_size, in_size), dtype=np.float64)
    np.add.at(W, (rows, cols.reshape(-1)), w.reshape(-1))
    return W.astype(np.float32)


def _resize_kernel(wh_ref, wwt_ref, x_ref, o_ref):
    # wh_ref : (H_out, H_in)     compute dtype, constant index_map -> resident
    # wwt_ref: (W_in, W_pad)     compute dtype, pre-transposed/padded on host
    # x_ref  : (B, H_in, W_in)   one batch of planes
    # o_ref  : (B, H_out, W_pad)
    b, h_in, w_in = x_ref.shape
    w_pad = wwt_ref.shape[1]
    cdt = wh_ref.dtype                      # compute dtype (f32 or bf16)

    x = x_ref[...].astype(cdt)

    # --- W pass: one flat MXU matmul with a large M (= B*H_in) dim. ---------
    t = jnp.dot(x.reshape(b * h_in, w_in), wwt_ref[...],
                preferred_element_type=jnp.float32)            # (B*H_in, W_pad)
    t = t.reshape(b, h_in, w_pad).astype(cdt)

    # --- H pass: per-plane MXU matmuls, each plane written straight into ----
    # o_ref (no Wh broadcast, no full f32 result block held live).  B is kept
    # small (<= 64) by the wrapper so this static unroll stays cheap.
    wh = wh_ref[...]
    for i in range(b):
        o_ref[i] = jnp.dot(wh, t[i],
                           preferred_element_type=jnp.float32).astype(o_ref.dtype)


def _onnx_resize_bicubic_impl(x: jnp.ndarray, scale_factor: float,
                              opmath_f32: bool = False) -> jnp.ndarray:
    """Equivalent of ONNXResizeBicubic.forward(x, scale_factor).
    x: (N, C, H, W). scale_factor must be a static Python float."""
    N, C, H, W = x.shape
    H_out = int(math.floor(H * scale_factor))
    W_out = int(math.floor(W * scale_factor))
    NC = N * C

    # bf16 inputs: bf16 MXU operands + f32 accumulation (unless exact PyTorch
    # f32 opmath is requested).  f32/f16 inputs use f32 weights.
    compute_dtype = (jnp.bfloat16
                     if (x.dtype == jnp.bfloat16 and not opmath_f32)
                     else jnp.float32)

    # Lane-dense output: pad W_out up to 128 lanes for small feature maps so
    # the matmul N dim and the output stores/DMAs are unmasked and contiguous.
    W_pad = W_out if W_out >= 128 else 128

    wh_np = _bicubic_weight_matrix(H, H_out, scale_factor)          # (H_out, H)
    wwt_np = _bicubic_weight_matrix(W, W_out, scale_factor).T       # (W, W_out)
    if W_pad != W_out:
        wwt_np = np.pad(wwt_np, ((0, 0), (0, W_pad - W_out)))       # (W, W_pad)
    wh = jnp.asarray(wh_np, dtype=compute_dtype)
    wwt = jnp.asarray(wwt_np, dtype=compute_dtype)

    isz = jnp.dtype(x.dtype).itemsize
    csz = jnp.dtype(compute_dtype).itemsize

    # Generation-aware VMEM budget (v7x has 64 MiB per TensorCore).
    try:
        info = pltpu.get_tpu_info()
        vmem_cap = int(getattr(info, "vmem_capacity_bytes", 0)) or 64 * 1024 * 1024
    except Exception:
        vmem_cap = 64 * 1024 * 1024
    vmem_budget = max(32 * 1024 * 1024, vmem_cap - 16 * 1024 * 1024)

    # Resident weight blocks (default pipeline double-buffers them).
    # TODO(synk): single-buffer the grid-invariant weights (pl.Buffered(1)) or
    # DMA them once into scratch to reclaim half of this.
    weight_bytes = 2 * csz * (H_out * H + W * W_pad)

    # Full per-plane per-step footprint: double-buffered in/out blocks in the
    # I/O dtype plus the f32 W-pass intermediate and cast copies.
    per_plane = (2 * H * W * isz              # input block (x2 buffers)
                 + 2 * H_out * W_pad * isz    # output block (x2 buffers)
                 + 4 * H * W_pad              # f32 W-pass result
                 + csz * H * W_pad            # recast t / slack
                 + csz * H * W                # x cast copy
                 + 4 * H_out * W_pad)         # per-plane f32 H-pass result
    data_budget = min(vmem_budget - weight_bytes - (4 << 20), 24 << 20)
    data_budget = max(data_budget, per_plane)
    B = max(1, int(data_budget // per_plane))
    B = min(B, NC, 64)                        # cap static unroll of the H pass
    # Keep >= 6 grid steps when possible: >= 3 iterations per TensorCore on
    # v7x (2 cores) so the software pipeline has something to overlap.
    min_steps = 6
    if NC >= min_steps:
        B = min(B, NC // min_steps)
    B = max(B, 1)
    num_blocks = pl.cdiv(NC, B)

    x_flat = x.reshape(NC, H, W)

    est = weight_bytes + B * per_plane
    vmem_limit = int(min(max(int(1.5 * est), 32 * 1024 * 1024), vmem_budget))

    flops = 2 * NC * (H * W * W_pad + H_out * H * W_pad)
    bytes_accessed = (NC * (H * W + H_out * W_pad) * isz
                      + csz * (H_out * H + W * W_pad))

    # TODO(synk): for very large planes (>= ~2K) exploit the 4-tap band
    # structure: tile H_out/W_out and feed only the matching input band and a
    # banded slice of Wh/Ww^T via index_map, instead of dense resident weights.
    out_flat = pl.pallas_call(
        _resize_kernel,
        out_shape=jax.ShapeDtypeStruct((NC, H_out, W_pad), x.dtype),
        grid=(num_blocks,),
        in_specs=[
            pl.BlockSpec((H_out, H), lambda i: (0, 0)),       # Wh, resident
            pl.BlockSpec((W, W_pad), lambda i: (0, 0)),       # Ww^T (padded), resident
            pl.BlockSpec((B, H, W), lambda i: (i, 0, 0)),     # B input planes
        ],
        out_specs=pl.BlockSpec((B, H_out, W_pad), lambda i: (i, 0, 0)),
        compiler_params=pltpu.CompilerParams(
            dimension_semantics=("parallel",),
            vmem_limit_bytes=vmem_limit,
        ),
        cost_estimate=pl.CostEstimate(
            flops=int(flops),
            transcendentals=0,
            bytes_accessed=int(bytes_accessed)),
    )(wh, wwt, x_flat)

    if W_pad != W_out:
        out_flat = out_flat[:, :, :W_out]
    return out_flat.reshape(N, C, H_out, W_out)


# Jitted public entry point: scale_factor / opmath_f32 are static, so the
# weight matrices are built once per (shape, scale) and cached with the trace.
onnx_resize_bicubic = jax.jit(_onnx_resize_bicubic_impl,
                              static_argnames=("scale_factor", "opmath_f32"))


if __name__ == "__main__":
    key = jax.random.PRNGKey(0)
    N, C, H, W = 2, 4, 16, 16
    x = jax.random.uniform(key, (N, C, H, W), dtype=jnp.float32)

    # Downscale (same factor as the module's ONNX-export example).
    sf = 0.75
    y = jax.block_until_ready(onnx_resize_bicubic(x, scale_factor=sf))
    Ho, Wo = int(math.floor(H * sf)), int(math.floor(W * sf))
    assert y.shape == (N, C, Ho, Wo), y.shape
    wh = jnp.asarray(_bicubic_weight_matrix(H, Ho, sf))
    ww = jnp.asarray(_bicubic_weight_matrix(W, Wo, sf))
    y_ref = jnp.einsum("oh,nchw,pw->ncop", wh, x, ww)
    np.testing.assert_allclose(np.asarray(y), np.asarray(y_ref), rtol=1e-5, atol=1e-5)

    # Upscale sanity check.
    sf2 = 2.0
    y2 = jax.block_until_ready(onnx_resize_bicubic(x, scale_factor=sf2))
    Ho2, Wo2 = int(math.floor(H * sf2)), int(math.floor(W * sf2))
    assert y2.shape == (N, C, Ho2, Wo2), y2.shape
    wh2 = jnp.asarray(_bicubic_weight_matrix(H, Ho2, sf2))
    ww2 = jnp.asarray(_bicubic_weight_matrix(W, Wo2, sf2))
    y2_ref = jnp.einsum("oh,nchw,pw->ncop", wh2, x, ww2)
    np.testing.assert_allclose(np.asarray(y2), np.asarray(y2_ref), rtol=1e-5, atol=1e-5)

    print("KERNEL_OK")
</pallas_src>

<mosaic_0001>
module attributes {stable_mosaic.version = 11 : i64} {
  func.func @_resize_kernel(%arg0: i32, %arg1: memref<12x16xf32, #tpu.memory_space<vmem>>, %arg2: memref<16x128xf32, #tpu.memory_space<vmem>>, %arg3: memref<1x16x16xf32, #tpu.memory_space<vmem>>, %arg4: memref<1x12x128xf32, #tpu.memory_space<vmem>>) attributes {dimension_semantics = [#tpu.dimension_semantics<parallel>], iteration_bounds = array<i64: 8>, scalar_prefetch = 0 : i64, scratch_operands = 0 : i64, tpu.core_type = #tpu.core_type<tc>, window_params = [{pipeline_mode = #tpu.pipeline_mode<synchronous>, transform_indices = @transform_0, window_bounds = array<i64: 12, 16>}, {pipeline_mode = #tpu.pipeline_mode<synchronous>, transform_indices = @transform_1, window_bounds = array<i64: 16, 128>}, {transform_indices = @transform_2, window_bounds = array<i64: 1, 16, 16>}, {transform_indices = @transform_3, window_bounds = array<i64: 1, 12, 128>}]} {
    %c0 = arith.constant 0 : index
    %c0_0 = arith.constant 0 : index
    %c0_1 = arith.constant 0 : index
    %0 = vector.load %arg3[%c0, %c0_0, %c0_1] : memref<1x16x16xf32, #tpu.memory_space<vmem>>, vector<1x16x16xf32>
    %1 = vector.shape_cast %0 : vector<1x16x16xf32> to vector<16x16xf32>
    %c0_2 = arith.constant 0 : index
    %c0_3 = arith.constant 0 : index
    %2 = vector.load %arg2[%c0_2, %c0_3] : memref<16x128xf32, #tpu.memory_space<vmem>>, vector<16x128xf32>
    %cst = arith.constant dense<0.000000e+00> : vector<16x128xf32>
    %3 = tpu.matmul %1, %2, %cst {dimension_numbers = #tpu.dot_dimension_numbers<[1], [0], [0], [1], [0, 0, 1, 1], [], []>} : vector<16x16xf32>, vector<16x128xf32>, vector<16x128xf32> -> vector<16x128xf32>
    %4 = vector.shape_cast %3 : vector<16x128xf32> to vector<1x16x128xf32>
    %c0_4 = arith.constant 0 : index
    %c0_5 = arith.constant 0 : index
    %5 = vector.load %arg1[%c0_4, %c0_5] : memref<12x16xf32, #tpu.memory_space<vmem>>, vector<12x16xf32>
    %6 = vector.shape_cast %4 : vector<1x16x128xf32> to vector<16x128xf32>
    %cst_6 = arith.constant dense<0.000000e+00> : vector<12x128xf32>
    %7 = tpu.matmul %5, %6, %cst_6 {dimension_numbers = #tpu.dot_dimension_numbers<[1], [0], [0], [1], [0, 0, 1, 1], [], []>} : vector<12x16xf32>, vector<16x128xf32>, vector<12x128xf32> -> vector<12x128xf32>
    %c0_7 = arith.constant 0 : index
    %c0_8 = arith.constant 0 : index
    %c0_9 = arith.constant 0 : index
    %8 = vector.load %arg4[%c0_7, %c0_8, %c0_9] : memref<1x12x128xf32, #tpu.memory_space<vmem>>, vector<1x12x128xf32>
    %9 = vector.shape_cast %8 : vector<1x12x128xf32> to vector<12x128xf32>
    %10 = vector.shape_cast %7 : vector<12x128xf32> to vector<1x12x128xf32>
    tpu.vector_store %arg4[%c0_7, %c0_8, %c0_9], %10 {strides = array<i32>} : memref<1x12x128xf32, #tpu.memory_space<vmem>>, vector<1x12x128xf32>,
    return
  }
  func.func @transform_0(%arg0: i32) -> (i32, i32) {
    %c0_i32 = arith.constant 0 : i32
    %c0_i32_0 = arith.constant 0 : i32
    %c0_i32_1 = arith.constant 0 : i32
    return %c0_i32, %c0_i32_0 : i32, i32
  }
  func.func @transform_1(%arg0: i32) -> (i32, i32) {
    %c0_i32 = arith.constant 0 : i32
    %c0_i32_0 = arith.constant 0 : i32
    %c0_i32_1 = arith.constant 0 : i32
    return %c0_i32, %c0_i32_0 : i32, i32
  }
  func.func @transform_2(%arg0: i32) -> (i32, i32, i32) {
    %c0_i32 = arith.constant 0 : i32
    %c0_i32_0 = arith.constant 0 : i32
    %c0_i32_1 = arith.constant 0 : i32
    return %arg0, %c0_i32, %c0_i32_0 : i32, i32, i32
  }
  func.func @transform_3(%arg0: i32) -> (i32, i32, i32) {
    %c0_i32 = arith.constant 0 : i32
    %c0_i32_0 = arith.constant 0 : i32
    %c0_i32_1 = arith.constant 0 : i32
    return %arg0, %c0_i32, %c0_i32_0 : i32, i32, i32
  }
}

</mosaic_0001>

<bundles_post_ra>
// kernel: _onnx_resize_bicubic_impl.1
= control target key start
LH: loop header
LB: loop body
LE: loop exit
PB: predicated region body
PF: predicated region fallthrough
CT: control target
= control target key end

     0   :  { %8 = vsyncpa [#allocation3], 0  ;;  %s931_s0 = inlined_call_operand.hbm [shape: f32[12,16], index: 0, kind: input, shape index: {}]   ;;  %s932_s1 = inlined_call_operand.hbm [shape: f32[16,128], index: 1, kind: input, shape index: {}]   ;;  %s933_s2 = inlined_call_operand.hbm [shape: f32[8,16,16], index: 2, kind: input, shape index: {}]   ;;  %s934_s3 = inlined_call_operand.vmem [shape: f32[8,12,128], index: 3, kind: output, shape index: {}]  }
   0x1   :  { %9 = vsyncpa [#allocation5], 0  ;;  %s744_s12 = smov 0   ;;  %s746_s13 = smov 0  }
   0x2   :  { %s748_s14 = smov 0   ;;  %s750_s15 = smov 0  }
   0x3 LB: > { %s763_s16 = sadd.s32 4294967295, %s717_s15   ;;  %s766_s17 = sadd.s32 1, %s717_s15   ;;  %s717_s15 = sphi %s750_s15, %s953_s15   ;;  %s713_s14 = sphi %s748_s14, %s952_s14   ;;  %s709_s13 = sphi %s746_s13, %s951_s13   ;;  %s705_s12 = sphi %s744_s12, %s950_s12  }
   0x4   : > { %s61_s18 = ssub.s32 %s717_s15, %s766_s17  ;;  %s64_s19 = sadd.s32 1, %s713_s14 }
   0x5   : > { %p62_p0 = scmp.eq.s32.totalorder %s61_s18, 0  ;;  %p71_p1 = scmp.ne.s32.totalorder %s713_s14, %s709_s13 }
   0x6   : > { %p72_p2 = scmp.eq.s32.totalorder %s717_s15, 0  ;;  %p77_p3 = scmp.ne.s32.totalorder %s709_s13, %s705_s12 }
   0x7   : > { %s776_s20 = scalar_select %p62_p0, %s713_s14, %s64_s19  }
   0x8   : > { %p73_p4 = por %p72_p2, %p71_p1  ;;  %p935_p5 = scmp.eq.s32.totalorder %s763_s16, 0 }
   0x9   : > { %p476_p6 = scmp.ge.s32.totalorder %s717_s15, 1  ;;  %p114_p7 = scmp.lt.s32.totalorder %s717_s15, 9 }
   0xa   : > { %p783_p8 = por %p935_p5, %p77_p3  ;;  %s719_s23 = smov [#allocation2]  }
   0xb   : > { %p787_p9 = pnand %p476_p6, %p114_p7  ;;  %s126_s24 = sshll.u32 %s719_s23, 4  ;;  %s127_s24 = int_to_ptr.vmem [resolvable:$true] %s126_s24 }
   0xc   : > { %s939_s21 = scalar_select %p783_p8, 1, 0 }
   0xd   : > { %s940_s22 = scalar_select %p787_p9, 1, 0 }
   0xe   : > { %p537_p10 = pneg %p787_p9  ;;  %p550_p12 = scmp.lt.s32.totalorder %s717_s15, 8 }
   0xf   : > { %s589_s29 = scalar_lea.hbm %s931_s0, 256 }
  0x10   : > { %p795_p11 = pnand %p537_p10, %p935_p5  ;;  %p800_p13 = pnand %p550_p12, %p73_p4 }
  0x11   : > { %p590_p0 = scmp.ne.s32.totalorder %s931_s0, %s589_s29  ;;  %p596_p4 = scmp.lt.u32.totalorder %s589_s29, %s931_s0 }
  0x12   : > { %s942_s26 = scalar_select %p800_p13, 1, 0 }
  0x13   : > { %p591_p1 = pneg %p795_p11 }
  0x15   : > { %p592_p2 = pnand %p591_p1, %p590_p0 }
  0x17   : > { %p593_p3 = pneg %p592_p2 }
  0x19   : > { %p598_p6 = pnand %p596_p4, %p593_p3 }
  0x1b   : > { %601 = shalt.err (!%p598_p6)
}
  0x1c   : > { %s602_s7 = scalar_lea.vmem %s127_s24, 256  ;;  %p610_p5 = scmp.lt.s32.totalorder %s127_s24, %s127_s24 }
  0x1d   : > { %p603_p7 = scmp.ne.s32.totalorder %s127_s24, %s602_s7  ;;  %p611_p8 = scmp.lt.s32.totalorder %s602_s7, %s602_s7 }
  0x1f   : > { %p605_p10 = pnand %p603_p7, %p591_p1  ;;  %p612_p9 = por %p611_p8, %p610_p5 }
  0x21   : > { %p606_p12 = pneg %p605_p10 }
  0x23   : > { %p613_p13 = pnand %p612_p9, %p606_p12 }
  0x25   : > { %616 = shalt.err (!%p613_p13)
}
  0x26   : > { %s720_s8 = smov 128   ;;  %s721_s9 = smov 8  }
  0x27   : > { %540 = dma.hbm_to_vmem [thread:$0]  (!%p795_p11), %s931_s0, 256, %s127_s24, [#allocation3], %s720_s8, %s720_s8, %s721_s9  }
  0x28   : > { %s722_s12 = smov [#allocation4]   ;;  %s153_s19 = sand.u32 1, %s717_s15  }
  0x29   : > { %s139_s18 = sshll.u32 %s722_s12, 4  ;;  %s617_s28 = scalar_lea.hbm %s932_s1, 256  ;;  %s140_s18 = int_to_ptr.vmem [resolvable:$true] %s139_s18 }
  0x2a   : > { %p618_p5 = scmp.ne.s32.totalorder %s932_s1, %s617_s28  ;;  %p624_p13 = scmp.lt.u32.totalorder %s617_s28, %s932_s1 }
  0x2c   : > { %p620_p8 = pnand %p618_p5, %p591_p1 }
  0x2e   : > { %p621_p9 = pneg %p620_p8 }
  0x30   : > { %p626_p0 = pnand %p624_p13, %p621_p9 }
  0x32   : > { %629 = shalt.err (!%p626_p0)
}
  0x33   : > { %s630_s24 = scalar_lea.vmem %s140_s18, 256  ;;  %p638_p6 = scmp.lt.s32.totalorder %s140_s18, %s140_s18 }
  0x34   : > { %p631_p2 = scmp.ne.s32.totalorder %s140_s18, %s630_s24  ;;  %p639_p7 = scmp.lt.s32.totalorder %s630_s24, %s630_s24 }
  0x36   : > { %p633_p3 = pnand %p631_p2, %p591_p1  ;;  %p640_p10 = por %p639_p7, %p638_p6 }
  0x38   : > { %p634_p4 = pneg %p633_p3 }
  0x3a   : > { %p641_p12 = pnand %p640_p10, %p634_p4 }
  0x3c   : > { %644 = shalt.err (!%p641_p12)
}
  0x3d   : > { %543 = dma.hbm_to_vmem [thread:$0]  (!%p795_p11), %s932_s1, 256, %s140_s18, [#allocation5], %s720_s8, %s720_s8, %s721_s9  }
  0x3e   : > { %s155_s10 = sand.u32 1, %s713_s14   ;;  %s495_s11 = sshll.u32 %s717_s15, 8 }
  0x3f   : > { %s480_s12 = sshll.u32 %s155_s10, 4  ;;  %s858_s28 = scalar_lea.hbm %s933_s2, %s495_s11 }
  0x40   : > { %s157_s25 = scalar_lea.vmem [#allocation6], %s480_s12  ;;  %s862_s30 = scalar_lea.sflag [#allocation3], %s153_s19 }
  0x41   : > { %s164_s29 = sshll.u32 %s157_s25, 4  ;;  %s645_s4 = scalar_lea.hbm %s858_s28, 256  ;;  %s860_s29 = int_to_ptr.vmem [resolvable:$true] %s164_s29 }
  0x42   : > { %p646_p11 = scmp.ne.s32.totalorder %s858_s28, %s645_s4  ;;  %p943_p1 = scmp.ne.s32.totalorder %s942_s26, 0 }
  0x43   : > { %s650_s5 = scalar_lea.hbm %s933_s2, 2048  ;;  %p651_p13 = scmp.lt.u32.totalorder %s858_s28, %s933_s2 }
  0x44   : > { %p647_p5 = pneg %p943_p1  ;;  %p652_p0 = scmp.lt.u32.totalorder %s650_s5, %s645_s4 }
  0x45   : > { %p654_p3 = scmp.lt.u32.totalorder %s645_s4, %s858_s28 }
  0x46   : > { %p648_p8 = pnand %p647_p5, %p646_p11  ;;  %p653_p2 = por %p652_p0, %p651_p13 }
  0x48   : > { %p649_p9 = pneg %p648_p8  ;;  %p655_p4 = por %p654_p3, %p653_p2 }
  0x4a   : > { %p656_p6 = pnand %p655_p4, %p649_p9 }
  0x4c   : > { %659 = shalt.err (!%p656_p6)
}
  0x4d   : > { %s660_s19 = scalar_lea.vmem %s860_s29, 256  ;;  %s723_s7 = smov [#allocation6]  }
  0x4e   : > { %p661_p7 = scmp.ne.s32.totalorder %s860_s29, %s660_s19  ;;  %s665_s10 = sshll.u32 %s723_s7, 4  ;;  %s666_s10 = int_to_ptr.vmem [resolvable:$false] %s665_s10 }
  0x4f   : > { %s667_s11 = scalar_lea.vmem %s666_s10, 512  ;;  %p668_p11 = scmp.lt.s32.totalorder %s860_s29, %s666_s10 }
  0x50   : > { %p663_p10 = pnand %p661_p7, %p647_p5  ;;  %p669_p8 = scmp.lt.s32.totalorder %s667_s11, %s660_s19 }
  0x52   : > { %p664_p12 = pneg %p663_p10  ;;  %p670_p13 = por %p669_p8, %p668_p11 }
  0x54   : > { %p671_p0 = pnand %p670_p13, %p664_p12 }
  0x56   : > { %674 = shalt.err (!%p671_p0)
}
  0x57   : > { %547 = dma.hbm_to_vmem [thread:$0]  (!%p943_p1), %s858_s28, 256, %s860_s29, %s862_s30, %s720_s8, %s720_s8, %s721_s9  }
  0x58   : > { %p944_p5 = scmp.ne.s32.totalorder %s940_s22, 0 }
  0x59   : > { %p945_p9 = scmp.eq.s32.totalorder (!%p944_p5), %s763_s16, 0 }
  0x5a   : > { %176 = sbr.rel (%p944_p5) target bundleno = 547 (0x223), region = 32 }
  0x61   : > { %692 = dma.done.wait (%p945_p9), [#allocation3], 256   ;;  %p946_p2 = pmov %p945_p9 }
  0x63   : > { %694 = vsyncadd (%p946_p2), [#allocation3], 4294967040  ;;  %p947_p3 = pmov %p946_p2 }
  0x64   : > { %p948_p4 = pmov %p946_p2 }
  0x65   : > { %696 = dma.done.wait (%p947_p3), [#allocation5], 256  }
  0x66   : > { %698 = vsyncadd (%p948_p4), [#allocation5], 4294967040  ;;  %s186_s26 = sand.u32 1, %s763_s16   ;;  %s188_s8 = sand.u32 1, %s709_s13  }
  0x67   : > { %s486_s9 = sshll.u32 %s188_s8, 4  ;;  %s187_s22 = scalar_lea.sflag [#allocation3], %s186_s26 }
  0x68   : > { %s190_s12 = scalar_lea.vmem [#allocation6], %s486_s9  ;;  %p949_p1 = scmp.ne.s32.totalorder %s939_s21, 0 }
  0x6a   : > { %700 = dma.done.wait (%p949_p1), %s187_s22, 256  }
  0x6b   : > { %702 = vsyncadd (%p949_p1), %s187_s22, 4294967040  ;;  %vm222_vm0 = vcmask 130048   ;;  %v220_v0 = vld [vmem:[#allocation4] sm:$0xff]  ;;  %v221_v1 = vld [vmem:[#allocation4 + $0x8] sm:$0xff]  ;;  %p213_p6 = scmp.lt.s32.totalorder %s763_s16, 7 }
  0x6c   : > { %v218_v2 = vld [vmem:[%s190_s12] sm:$0xff]  ;;  %v519_v3 = vpack.c.bf16 %v221_v1, %v220_v0  ;;  %v219_v4 = vld [vmem:[%s190_s12 + $0x8] sm:$0xff] }
  0x6d   : > { %509 = vmatprep.mubr.msk.f32.mxu0 %vm222_vm0, %v218_v2  ;;  %v304_v5 = vld [vmem:[#allocation2] sm:$0xff]  ;;  %v305_v9 = vld [vmem:[#allocation2 + $0x8] sm:$0xf]  ;;  %s955_s16 = smov (!%p213_p6, %s763_s16), 7 }
  0x6e   : > { %520 = vmatprep.subr.bf16.mxu0 %v519_v3  ;;  %516 = vmatprep.mubr.msk.f32.mxu1 %vm222_vm0, %v304_v5  ;;  %s496_s21 = sshll.u32 %s955_s16, 4 }
  0x6f   : > { %522 = vmatpush3.bf16.msra.mxu0 %v519_v3  ;;  %s217_s28 = scalar_lea.vmem %s934_s3, %s496_s21 }
  0x72   : > { %510 = vmatmul.mubr.msk.f32.vlgmr.msra.gmra.mrb[0].mxu0 %vm222_vm0, %v219_v4 }
 0x145   : > { %v511_v6 = vpop.f32.mrb[0].mxu0 }
 0x146   : > { %v295_v7 = vpop.f32.mrb[1].mxu0 }
 0x147   : > { %v523_v8 = vpack.c.bf16 %v511_v6, %v295_v7 }
 0x149   : > { %524 = vmatprep.subr.bf16.mxu1 %v523_v8 }
 0x14a   : > { %526 = vmatpush3.bf16.msra.mxu1 %v523_v8 }
 0x14d   : > { %517 = vmatmul.mubr.msk.f32.vlgmr.msra.gmra.mrb[0].mxu1 %vm222_vm0, %v305_v9 }
 0x220   : > { %v518_v10 = vpop.f32.mrb[0].mxu1 }
 0x221   : > { %388 = vst [vmem:[%s217_s28 + $0x8] sm:$0xf] %v518_v10  ;;  %v378_v11 = vpop.f32.mrb[1].mxu1 }
 0x222   : > { %387 = vst [vmem:[%s217_s28] sm:$0xff] %v378_v11 }
 0x223 PF: > { %p12_p7 = scmp.ge.s32.totalorder %s766_s17, 10   ;;  %s950_s12 = smov %s709_s13 }
 0x224   : > { %s951_s13 = smov %s713_s14  ;;  %s952_s14 = smov %s776_s20 }
 0x225   : > { %s953_s15 = smov %s766_s17  ;;  %14 = sbr.rel (!%p12_p7) target bundleno = 3 (0x3), region = 79 }
 0x22c   :  { %410 = vsyncpa [#allocation3], 1 }
 0x22d   :  { %412 = vsyncpa [#allocation3 + $0x1], 1 }
 0x22e   :  { %413 = vsyncpa [#allocation5], 1 }

</bundles_post_ra>
